<compile_context>
chip_gen: v7x
topology: tpu7x:2x2x1
jax: 0.10.0
libtpu: 0.0.40
codegen_flags: <defaults>
</compile_context>

<pallas_src>
import math
import functools

import jax
import jax.numpy as jnp
from jax import lax
from jax.experimental import pallas as pl
from jax.experimental.pallas import tpu as pltpu


def _round_up(x: int, m: int) -> int:
    return ((x + m - 1) // m) * m


# --------------------------------------------------------------------------
# Fast path: embedding table resident in VMEM, gather via dynamic row indexing
# --------------------------------------------------------------------------
def _embedding_vmem_kernel(ids_ref, emb_ref, out_ref, *, tile, vocab_size, scale):
    """ids_ref: (n_pad,) int32 in SMEM; emb_ref: (V, Dp) VMEM; out_ref: (tile, Dp)."""
    base = pl.program_id(0) * tile

    def _row(t, carry):
        tok = ids_ref[base + t]
        tok = jnp.minimum(jnp.maximum(tok, 0), vocab_size - 1)
        row = emb_ref[pl.ds(tok, 1), :].astype(jnp.float32)
        out_ref[pl.ds(t, 1), :] = (row * scale).astype(out_ref.dtype)
        return carry

    # Unrolled so the scheduler can interleave SMEM id loads / clamps / row copies.
    lax.fori_loop(0, tile, _row, 0, unroll=8)


# --------------------------------------------------------------------------
# Large-table path: per-row HBM DMAs, double-buffered across grid steps
# --------------------------------------------------------------------------
def _embedding_hbm_kernel(ids_ref, emb_hbm, out_ref, row_buf, copy_sem, *,
                          tile, vocab_size, scale):
    """ids_ref: (n_pad,) int32 SMEM; emb_hbm: (V, Dp) HBM; out_ref: (tile, Dp) VMEM;
    row_buf: (2*tile, Dp) VMEM scratch (two slots); copy_sem: (2,) DMA semaphores."""
    step = pl.program_id(0)
    nsteps = pl.num_programs(0)
    slot = step % 2

    def _issue(s, dst_slot):
        base = s * tile
        buf_base = dst_slot * tile

        def _start(t, carry):
            tok = ids_ref[base + t]
            tok = jnp.minimum(jnp.maximum(tok, 0), vocab_size - 1)
            pltpu.make_async_copy(
                emb_hbm.at[pl.ds(tok, 1), :],
                row_buf.at[pl.ds(buf_base + t, 1), :],
                copy_sem.at[dst_slot],
            ).start()
            return carry

        lax.fori_loop(0, tile, _start, 0, unroll=8)

    # Prime: the very first step issues its own gather.
    @pl.when(step == 0)
    def _():
        _issue(0, 0)

    # Prefetch the NEXT tile's rows into the other slot before waiting on ours,
    # hiding HBM gather latency behind this step's wait/compute/write-back.
    @pl.when(step + 1 < nsteps)
    def _():
        _issue(step + 1, 1 - slot)

    off = pl.multiple_of(slot * tile, 8)
    other = pl.multiple_of((1 - slot) * tile, 8)

    # Single byte-count-matched wait: DMA semaphores count bytes, so one wait of
    # tile*Dp*itemsize covers all `tile` row copies issued into this slot.
    pltpu.make_async_copy(
        row_buf.at[pl.ds(other, tile), :],   # placeholder source, same byte count
        row_buf.at[pl.ds(off, tile), :],
        copy_sem.at[slot],
    ).wait()

    rows = row_buf[pl.ds(off, tile), :].astype(jnp.float32)
    out_ref[...] = (rows * scale).astype(out_ref.dtype)


# --------------------------------------------------------------------------
# Wrapper
# --------------------------------------------------------------------------
def input_embeddings(x, emb, *, tile=256, force_hbm=False):
    """Pallas equivalent of InputEmbeddings.forward.

    x:   (batch, seq) integer token ids
    emb: (vocab_size, d_model) embedding weights
    returns (batch, seq, d_model) in emb.dtype
    """
    batch, seq = x.shape
    vocab, d_model = emb.shape
    n = batch * seq
    esize = jnp.dtype(emb.dtype).itemsize

    # Lane-dense last dim: pad d_model to a multiple of 128 (unmasked vst on stores).
    d_model_p = _round_up(d_model, 128)
    if d_model_p != d_model:
        emb = jnp.pad(emb, ((0, 0), (0, d_model_p - d_model)))

    # Per-generation VMEM capacity (64 MiB v7x, 128 MiB v5e/v6e).
    try:
        vmem_cap = int(pltpu.get_tpu_info().vmem_capacity_bytes)
    except Exception:
        vmem_cap = 64 * 1024 * 1024

    # --- tile selection ---
    tile = max(8, _round_up(tile, 8))
    # Keep HBM-path buffers (2x row_buf slots + 2x pipelined out blocks) <= ~60% of VMEM.
    max_tile_vmem = max(8, ((vmem_cap * 3 // 5) // (4 * d_model_p * esize)) // 8 * 8)
    tile = min(tile, max_tile_vmem)
    # Aim for >= ~4 grid steps so v7x's two TensorCores both get work (fast path).
    max_tile_steps = _round_up(max(8, -(-n // 4)), 8)
    tile = max(8, min(tile, max_tile_steps, _round_up(n, 8)))

    n_pad = _round_up(n, tile)
    grid = (n_pad // tile,)

    # Flatten + pad the ids (padded slots gather row 0 and are sliced off below).
    ids = jnp.pad(x.reshape(-1).astype(jnp.int32), (0, n_pad - n))
    scale = float(math.sqrt(d_model))

    table_bytes = vocab * d_model_p * esize
    out_block_bytes = tile * d_model_p * esize
    # Conservative: assume both the table block and output block are double-buffered.
    fast_path = (not force_hbm) and (
        2 * table_bytes + 2 * out_block_bytes <= vmem_cap - (8 << 20))

    if fast_path:
        kernel = functools.partial(_embedding_vmem_kernel,
                                   tile=tile, vocab_size=vocab, scale=scale)
        need = 2 * table_bytes + 2 * out_block_bytes
        grid_spec = pltpu.PrefetchScalarGridSpec(
            num_scalar_prefetch=1,                       # ids -> SMEM
            grid=grid,
            in_specs=[
                # Whole table as one VMEM block; constant index_map -> fetched once.
                pl.BlockSpec((vocab, d_model_p), lambda i, ids: (0, 0)),
            ],
            out_specs=pl.BlockSpec((tile, d_model_p), lambda i, ids: (i, 0)),
        )
        dim_sem = ("parallel",)
    else:
        kernel = functools.partial(_embedding_hbm_kernel,
                                   tile=tile, vocab_size=vocab, scale=scale)
        need = 2 * tile * d_model_p * esize + 2 * out_block_bytes
        grid_spec = pltpu.PrefetchScalarGridSpec(
            num_scalar_prefetch=1,                       # ids -> SMEM (drive DMA offsets)
            grid=grid,
            in_specs=[
                pl.BlockSpec(memory_space=pl.ANY),       # table stays in HBM
            ],
            out_specs=pl.BlockSpec((tile, d_model_p), lambda i, ids: (i, 0)),
            scratch_shapes=[
                pltpu.VMEM((2 * tile, d_model_p), emb.dtype),  # 2 gather slots
                pltpu.SemaphoreType.DMA((2,)),                 # per-slot DMA sems
            ],
        )
        # Cross-step prefetch requires in-order execution of the grid axis.
        dim_sem = ("arbitrary",)

    vmem_limit = int(min(vmem_cap, max(need + (8 << 20), 32 << 20)))

    out_flat = pl.pallas_call(
        kernel,
        out_shape=jax.ShapeDtypeStruct((n_pad, d_model_p), emb.dtype),
        grid_spec=grid_spec,
        compiler_params=pltpu.CompilerParams(
            dimension_semantics=dim_sem,
            vmem_limit_bytes=vmem_limit),
        cost_estimate=pl.CostEstimate(
            flops=n_pad * d_model_p,                     # the scale multiply
            transcendentals=0,
            bytes_accessed=(2 * n_pad * d_model_p * esize   # gathered rows + output
                            + n_pad * 4)),                  # ids
    )(ids, emb)

    return out_flat[:n, :d_model].reshape(batch, seq, d_model)


if __name__ == "__main__":
    # Small but TPU-friendly shapes: lane-dense d_model (multiple of 128).
    d_model = 128
    vocab_size = 256
    batch, seq = 2, 8

    key = jax.random.PRNGKey(0)
    k_emb, k_ids = jax.random.split(key)

    # Deterministic synthetic parameters (nn.Embedding weight ~ N(0, 1)).
    emb = jax.random.normal(k_emb, (vocab_size, d_model), dtype=jnp.float32)
    x = jax.random.randint(k_ids, (batch, seq), 0, vocab_size, dtype=jnp.int32)

    # Exercise both paths: the VMEM-resident fast path (default for this small
    # table) and the HBM row-gather path (used for tables too big for VMEM).
    out_fast = input_embeddings(x, emb)
    out_hbm = input_embeddings(x, emb, force_hbm=True)
    jax.block_until_ready((out_fast, out_hbm))

    # Pure-JAX reference: embedding lookup * sqrt(d_model)
    ref = emb[x] * math.sqrt(d_model)

    for out in (out_fast, out_hbm):
        assert out.shape == (batch, seq, d_model), out.shape
        assert out.dtype == jnp.float32, out.dtype
        assert jnp.allclose(out, ref, atol=1e-5, rtol=1e-5), "mismatch vs reference"

    print("KERNEL_OK")
</pallas_src>

<mosaic_0001>
module attributes {stable_mosaic.version = 11 : i64} {
  func.func @_embedding_vmem_kernel(%arg0: i32, %arg1: memref<16xi32, #tpu.memory_space<smem>>, %arg2: memref<256x128xf32, #tpu.memory_space<vmem>>, %arg3: memref<8x128xf32, #tpu.memory_space<vmem>>) attributes {dimension_semantics = [#tpu.dimension_semantics<parallel>], iteration_bounds = array<i64: 2>, scalar_prefetch = 1 : i64, scratch_operands = 0 : i64, tpu.core_type = #tpu.core_type<tc>, window_params = [{pipeline_mode = #tpu.pipeline_mode<synchronous>, transform_indices = @transform_0, window_bounds = array<i64: 256, 128>}, {transform_indices = @transform_1, window_bounds = array<i64: 8, 128>}]} {
    %c8_i32 = arith.constant 8 : i32
    %0 = arith.muli %arg0, %c8_i32 : i32
    %c0_i32 = arith.constant 0 : i32
    %1 = arith.addi %0, %c0_i32 : i32
    %2 = arith.index_cast %1 : i32 to index
    %3 = memref.load %arg1[%2] : memref<16xi32, #tpu.memory_space<smem>>
    %c0_i32_0 = arith.constant 0 : i32
    %4 = arith.maxsi %3, %c0_i32_0 : i32
    %c255_i32 = arith.constant 255 : i32
    %5 = arith.minsi %4, %c255_i32 : i32
    %6 = arith.index_cast %5 : i32 to index
    %c0 = arith.constant 0 : index
    %7 = vector.load %arg2[%6, %c0] : memref<256x128xf32, #tpu.memory_space<vmem>>, vector<1x128xf32>
    %cst = arith.constant 11.3137083 : f32
    %8 = vector.broadcast %cst : f32 to vector<1x128xf32>
    %9 = arith.mulf %7, %8 : vector<1x128xf32>
    %10 = arith.index_cast %c0_i32 : i32 to index
    %c0_1 = arith.constant 0 : index
    %11 = vector.load %arg3[%10, %c0_1] : memref<8x128xf32, #tpu.memory_space<vmem>>, vector<1x128xf32>
    tpu.vector_store %arg3[%10, %c0_1], %9 {strides = array<i32>} : memref<8x128xf32, #tpu.memory_space<vmem>>, vector<1x128xf32>,
    %c1_i32 = arith.constant 1 : i32
    %12 = arith.addi %0, %c1_i32 : i32
    %13 = arith.index_cast %12 : i32 to index
    %14 = memref.load %arg1[%13] : memref<16xi32, #tpu.memory_space<smem>>
    %c0_i32_2 = arith.constant 0 : i32
    %15 = arith.maxsi %14, %c0_i32_2 : i32
    %c255_i32_3 = arith.constant 255 : i32
    %16 = arith.minsi %15, %c255_i32_3 : i32
    %17 = arith.index_cast %16 : i32 to index
    %c0_4 = arith.constant 0 : index
    %18 = vector.load %arg2[%17, %c0_4] : memref<256x128xf32, #tpu.memory_space<vmem>>, vector<1x128xf32>
    %cst_5 = arith.constant 11.3137083 : f32
    %19 = vector.broadcast %cst_5 : f32 to vector<1x128xf32>
    %20 = arith.mulf %18, %19 : vector<1x128xf32>
    %21 = arith.index_cast %c1_i32 : i32 to index
    %c0_6 = arith.constant 0 : index
    %22 = vector.load %arg3[%21, %c0_6] : memref<8x128xf32, #tpu.memory_space<vmem>>, vector<1x128xf32>
    tpu.vector_store %arg3[%21, %c0_6], %20 {strides = array<i32>} : memref<8x128xf32, #tpu.memory_space<vmem>>, vector<1x128xf32>,
    %c2_i32 = arith.constant 2 : i32
    %23 = arith.addi %0, %c2_i32 : i32
    %24 = arith.index_cast %23 : i32 to index
    %25 = memref.load %arg1[%24] : memref<16xi32, #tpu.memory_space<smem>>
    %c0_i32_7 = arith.constant 0 : i32
    %26 = arith.maxsi %25, %c0_i32_7 : i32
    %c255_i32_8 = arith.constant 255 : i32
    %27 = arith.minsi %26, %c255_i32_8 : i32
    %28 = arith.index_cast %27 : i32 to index
    %c0_9 = arith.constant 0 : index
    %29 = vector.load %arg2[%28, %c0_9] : memref<256x128xf32, #tpu.memory_space<vmem>>, vector<1x128xf32>
    %cst_10 = arith.constant 11.3137083 : f32
    %30 = vector.broadcast %cst_10 : f32 to vector<1x128xf32>
    %31 = arith.mulf %29, %30 : vector<1x128xf32>
    %32 = arith.index_cast %c2_i32 : i32 to index
    %c0_11 = arith.constant 0 : index
    %33 = vector.load %arg3[%32, %c0_11] : memref<8x128xf32, #tpu.memory_space<vmem>>, vector<1x128xf32>
    tpu.vector_store %arg3[%32, %c0_11], %31 {strides = array<i32>} : memref<8x128xf32, #tpu.memory_space<vmem>>, vector<1x128xf32>,
    %c3_i32 = arith.constant 3 : i32
    %34 = arith.addi %0, %c3_i32 : i32
    %35 = arith.index_cast %34 : i32 to index
    %36 = memref.load %arg1[%35] : memref<16xi32, #tpu.memory_space<smem>>
    %c0_i32_12 = arith.constant 0 : i32
    %37 = arith.maxsi %36, %c0_i32_12 : i32
    %c255_i32_13 = arith.constant 255 : i32
    %38 = arith.minsi %37, %c255_i32_13 : i32
    %39 = arith.index_cast %38 : i32 to index
    %c0_14 = arith.constant 0 : index
    %40 = vector.load %arg2[%39, %c0_14] : memref<256x128xf32, #tpu.memory_space<vmem>>, vector<1x128xf32>
    %cst_15 = arith.constant 11.3137083 : f32
    %41 = vector.broadcast %cst_15 : f32 to vector<1x128xf32>
    %42 = arith.mulf %40, %41 : vector<1x128xf32>
    %43 = arith.index_cast %c3_i32 : i32 to index
    %c0_16 = arith.constant 0 : index
    %44 = vector.load %arg3[%43, %c0_16] : memref<8x128xf32, #tpu.memory_space<vmem>>, vector<1x128xf32>
    tpu.vector_store %arg3[%43, %c0_16], %42 {strides = array<i32>} : memref<8x128xf32, #tpu.memory_space<vmem>>, vector<1x128xf32>,
    %c4_i32 = arith.constant 4 : i32
    %45 = arith.addi %0, %c4_i32 : i32
    %46 = arith.index_cast %45 : i32 to index
    %47 = memref.load %arg1[%46] : memref<16xi32, #tpu.memory_space<smem>>
    %c0_i32_17 = arith.constant 0 : i32
    %48 = arith.maxsi %47, %c0_i32_17 : i32
    %c255_i32_18 = arith.constant 255 : i32
    %49 = arith.minsi %48, %c255_i32_18 : i32
    %50 = arith.index_cast %49 : i32 to index
    %c0_19 = arith.constant 0 : index
    %51 = vector.load %arg2[%50, %c0_19] : memref<256x128xf32, #tpu.memory_space<vmem>>, vector<1x128xf32>
    %cst_20 = arith.constant 11.3137083 : f32
    %52 = vector.broadcast %cst_20 : f32 to vector<1x128xf32>
    %53 = arith.mulf %51, %52 : vector<1x128xf32>
    %54 = arith.index_cast %c4_i32 : i32 to index
    %c0_21 = arith.constant 0 : index
    %55 = vector.load %arg3[%54, %c0_21] : memref<8x128xf32, #tpu.memory_space<vmem>>, vector<1x128xf32>
    tpu.vector_store %arg3[%54, %c0_21], %53 {strides = array<i32>} : memref<8x128xf32, #tpu.memory_space<vmem>>, vector<1x128xf32>,
    %c5_i32 = arith.constant 5 : i32
    %56 = arith.addi %0, %c5_i32 : i32
    %57 = arith.index_cast %56 : i32 to index
    %58 = memref.load %arg1[%57] : memref<16xi32, #tpu.memory_space<smem>>
    %c0_i32_22 = arith.constant 0 : i32
    %59 = arith.maxsi %58, %c0_i32_22 : i32
    %c255_i32_23 = arith.constant 255 : i32
    %60 = arith.minsi %59, %c255_i32_23 : i32
    %61 = arith.index_cast %60 : i32 to index
    %c0_24 = arith.constant 0 : index
    %62 = vector.load %arg2[%61, %c0_24] : memref<256x128xf32, #tpu.memory_space<vmem>>, vector<1x128xf32>
    %cst_25 = arith.constant 11.3137083 : f32
    %63 = vector.broadcast %cst_25 : f32 to vector<1x128xf32>
    %64 = arith.mulf %62, %63 : vector<1x128xf32>
    %65 = arith.index_cast %c5_i32 : i32 to index
    %c0_26 = arith.constant 0 : index
    %66 = vector.load %arg3[%65, %c0_26] : memref<8x128xf32, #tpu.memory_space<vmem>>, vector<1x128xf32>
    tpu.vector_store %arg3[%65, %c0_26], %64 {strides = array<i32>} : memref<8x128xf32, #tpu.memory_space<vmem>>, vector<1x128xf32>,
    %c6_i32 = arith.constant 6 : i32
    %67 = arith.addi %0, %c6_i32 : i32
    %68 = arith.index_cast %67 : i32 to index
    %69 = memref.load %arg1[%68] : memref<16xi32, #tpu.memory_space<smem>>
    %c0_i32_27 = arith.constant 0 : i32
    %70 = arith.maxsi %69, %c0_i32_27 : i32
    %c255_i32_28 = arith.constant 255 : i32
    %71 = arith.minsi %70, %c255_i32_28 : i32
    %72 = arith.index_cast %71 : i32 to index
    %c0_29 = arith.constant 0 : index
    %73 = vector.load %arg2[%72, %c0_29] : memref<256x128xf32, #tpu.memory_space<vmem>>, vector<1x128xf32>
    %cst_30 = arith.constant 11.3137083 : f32
    %74 = vector.broadcast %cst_30 : f32 to vector<1x128xf32>
    %75 = arith.mulf %73, %74 : vector<1x128xf32>
    %76 = arith.index_cast %c6_i32 : i32 to index
    %c0_31 = arith.constant 0 : index
    %77 = vector.load %arg3[%76, %c0_31] : memref<8x128xf32, #tpu.memory_space<vmem>>, vector<1x128xf32>
    tpu.vector_store %arg3[%76, %c0_31], %75 {strides = array<i32>} : memref<8x128xf32, #tpu.memory_space<vmem>>, vector<1x128xf32>,
    %c7_i32 = arith.constant 7 : i32
    %78 = arith.addi %0, %c7_i32 : i32
    %79 = arith.index_cast %78 : i32 to index
    %80 = memref.load %arg1[%79] : memref<16xi32, #tpu.memory_space<smem>>
    %c0_i32_32 = arith.constant 0 : i32
    %81 = arith.maxsi %80, %c0_i32_32 : i32
    %c255_i32_33 = arith.constant 255 : i32
    %82 = arith.minsi %81, %c255_i32_33 : i32
    %83 = arith.index_cast %82 : i32 to index
    %c0_34 = arith.constant 0 : index
    %84 = vector.load %arg2[%83, %c0_34] : memref<256x128xf32, #tpu.memory_space<vmem>>, vector<1x128xf32>
    %cst_35 = arith.constant 11.3137083 : f32
    %85 = vector.broadcast %cst_35 : f32 to vector<1x128xf32>
    %86 = arith.mulf %84, %85 : vector<1x128xf32>
    %87 = arith.index_cast %c7_i32 : i32 to index
    %c0_36 = arith.constant 0 : index
    %88 = vector.load %arg3[%87, %c0_36] : memref<8x128xf32, #tpu.memory_space<vmem>>, vector<1x128xf32>
    tpu.vector_store %arg3[%87, %c0_36], %86 {strides = array<i32>} : memref<8x128xf32, #tpu.memory_space<vmem>>, vector<1x128xf32>,
    %c8_i32_37 = arith.constant 8 : i32
    return
  }
  func.func @transform_0(%arg0: i32, %arg1: memref<16xi32, #tpu.memory_space<smem>>) -> (i32, i32) {
    %c0_i32 = arith.constant 0 : i32
    %c0_i32_0 = arith.constant 0 : i32
    %c0_i32_1 = arith.constant 0 : i32
    return %c0_i32, %c0_i32_0 : i32, i32
  }
  func.func @transform_1(%arg0: i32, %arg1: memref<16xi32, #tpu.memory_space<smem>>) -> (i32, i32) {
    %c0_i32 = arith.constant 0 : i32
    %c0_i32_0 = arith.constant 0 : i32
    return %arg0, %c0_i32 : i32, i32
  }
}

</mosaic_0001>

<bundles_post_ra>
// kernel: tpu_custom_call.1
= control target key start
LH: loop header
LB: loop body
LE: loop exit
PB: predicated region body
PF: predicated region fallthrough
CT: control target
= control target key end

     0   :  { %s706_s0 = inlined_call_operand.hbm [shape: s32[16], index: 0, kind: input, shape index: {}]   ;;  %s707_s1 = inlined_call_operand.hbm [shape: f32[256,128], index: 1, kind: input, shape index: {}]   ;;  %s708_s2 = inlined_call_operand.hbm [shape: f32[16,128], index: 2, kind: output, shape index: {}]  }
   0x1   :  { %s396_s11 = scalar_lea.hbm %s706_s0, 16 }
   0x2   :  { %p397_p0 = scmp.ne.s32.totalorder %s706_s0, %s396_s11  ;;  %p400_p1 = scmp.lt.u32.totalorder %s396_s11, %s706_s0 }
   0x4   :  { %p402_p2 = pnand %p400_p1, %p397_p0 }
   0x6   :  { %405 = shalt.err (!%p402_p2)  }
   0x7   :  { %s504_s16 = smov [#allocation3]  }
   0x8   :  { %8 = dma.hbm_to_smem %s706_s0, 16, %s504_s16, [#allocation2] }
   0x9   :  { %478 = dma.done.wait [#allocation2], 16 }
   0xa   :  { %479 = vsyncadd [#allocation2], 4294967280 }
   0xb   :  { %10 = sfence }
   0xc   :  { %11 = vsyncpa [#allocation5], 0 }
   0xd   :  { %12 = vsyncpa [#allocation6], 0 }
   0xe   :  { %14 = vsyncpa [#allocation6 + $0x1], 0  ;;  %s536_s19 = smov 0   ;;  %s538_s20 = smov 0  }
   0xf   :  { %s540_s21 = smov 0   ;;  %s542_s22 = smov 0  }
  0x10 LB: > { %s557_s0 = sadd.s32 4294967295, %s502_s22   ;;  %s276_s23 = sadd.s32 4294967294, %s502_s22   ;;  %s502_s22 = sphi %s542_s22, %s724_s22   ;;  %s498_s21 = sphi %s540_s21, %s723_s21   ;;  %s494_s20 = sphi %s538_s20, %s722_s20   ;;  %s490_s19 = sphi %s536_s19, %s721_s19  }
  0x11   : > { %s561_s24 = sadd.s32 1, %s502_s22   ;;  %s48_s25 = sadd.s32 1, %s498_s21 }
  0x12   : > { %s45_s26 = ssub.s32 %s502_s22, %s561_s24  ;;  %p58_p3 = scmp.ne.s32.totalorder %s498_s21, %s494_s20 }
  0x13   : > { %p46_p4 = scmp.eq.s32.totalorder %s45_s26, 0  ;;  %p59_p5 = scmp.eq.s32.totalorder %s557_s0, 1 }
  0x14   : > { %p64_p6 = scmp.ne.s32.totalorder %s494_s20, %s490_s19  ;;  %p65_p7 = scmp.eq.s32.totalorder %s276_s23, 1 }
  0x15   : > { %s572_s27 = scalar_select %p46_p4, %s498_s21, %s48_s25  }
  0x16   : > { %p574_p8 = por %p59_p5, %p58_p3  ;;  %p578_p9 = por %p65_p7, %p64_p6 }
  0x17   : > { %p277_p10 = scmp.ge.s32.totalorder %s502_s22, 1  ;;  %p72_p11 = scmp.lt.s32.totalorder %s502_s22, 3 }
  0x18   : > { %s712_s28 = scalar_select %p574_p8, 1, 0 }
  0x19   : > { %s713_s29 = scalar_select %p578_p9, 1, 0 }
  0x1a   : > { %p709_p12 = scmp.eq.s32.totalorder %s557_s0, 0  ;;  %p585_p13 = pnand %p277_p10, %p72_p11 }
  0x1b   : > { %s505_s3 = smov [#allocation4]   ;;  %s406_s8 = scalar_lea.hbm %s707_s1, 4096 }
  0x1c   : > { %s714_s30 = scalar_select %p585_p13, 1, 0 }
  0x1d   : > { %s84_s4 = sshll.u32 %s505_s3, 4  ;;  %p349_p0 = pneg %p585_p13  ;;  %s85_s4 = int_to_ptr.vmem [resolvable:$true] %s84_s4 }
  0x1e   : > { %p407_p2 = scmp.ne.s32.totalorder %s707_s1, %s406_s8  ;;  %p413_p6 = scmp.lt.u32.totalorder %s406_s8, %s707_s1 }
  0x1f   : > { %p593_p1 = pnand %p709_p12, %p349_p0 }
  0x21   : > { %p408_p3 = pneg %p593_p1 }
  0x23   : > { %p409_p4 = pnand %p408_p3, %p407_p2 }
  0x25   : > { %p410_p5 = pneg %p409_p4 }
  0x27   : > { %p415_p7 = pnand %p413_p6, %p410_p5 }
  0x29   : > { %418 = shalt.err (!%p415_p7)
}
  0x2a   : > { %s419_s13 = scalar_lea.vmem %s85_s4, 4096  ;;  %p427_p12 = scmp.lt.s32.totalorder %s85_s4, %s85_s4 }
  0x2b   : > { %p420_p10 = scmp.ne.s32.totalorder %s85_s4, %s419_s13  ;;  %p428_p9 = scmp.lt.s32.totalorder %s419_s13, %s419_s13 }
  0x2d   : > { %p422_p11 = pnand %p420_p10, %p408_p3  ;;  %p429_p8 = por %p428_p9, %p427_p12 }
  0x2f   : > { %p423_p0 = pneg %p422_p11 }
  0x31   : > { %p430_p13 = pnand %p429_p8, %p423_p0 }
  0x33   : > { %433 = shalt.err (!%p430_p13)
}
  0x34   : > { %s506_s14 = smov 128   ;;  %s507_s15 = smov 8  }
  0x35   : > { %352 = dma.hbm_to_vmem [thread:$0]  (!%p593_p1), %s707_s1, 4096, %s85_s4, [#allocation5], %s506_s14, %s506_s14, %s507_s15  }
  0x36   : > { %p716_p2 = scmp.ne.s32.totalorder %s714_s30, 0 }
  0x37   : > { %p717_p4 = scmp.eq.s32.totalorder (!%p716_p2), %s557_s0, 0 }
  0x38   : > { %100 = sbr.rel (%p716_p2) target bundleno = 120 (0x78), region = 24 }
  0x3f   : > { %481 = dma.done.wait (%p717_p4), [#allocation5], 4096   ;;  %p718_p3 = pmov %p717_p4 }
  0x40   : > { %s112_s18 = sand.u32 1, %s494_s20   ;;  %s621_s23 = sshll.u32 %s557_s0, 3 }
  0x41   : > { %483 = vsyncadd (%p718_p3), [#allocation5], 4294963200  ;;  %s281_s25 = sshll.u32 %s112_s18, 3  ;;  %s116_s26 = sld [smem:[#allocation3 + %s621_s23]] }
  0x42   : > { %s125_s30 = sadd.s32 1, %s621_s23  ;;  %s135_s3 = sadd.s32 2, %s621_s23 }
  0x43   : > { %s126_s4 = sld [smem:[#allocation3 + %s125_s30]]  ;;  %s145_s6 = sadd.s32 3, %s621_s23 }
  0x44   : > { %s136_s5 = sld [smem:[#allocation3 + %s135_s3]]  ;;  %s155_s7 = sadd.s32 4, %s621_s23 }
  0x45   : > { %s630_s8 = sld [smem:[#allocation3 + %s145_s6]]  ;;  %s165_s10 = sadd.s32 5, %s621_s23 }
  0x46   : > { %s632_s9 = sld [smem:[#allocation3 + %s155_s7]]  ;;  %s175_s11 = sadd.s32 6, %s621_s23 }
  0x47   : > { %p117_p8 = scmp.gt.s32.totalorder %s116_s26, 0  ;;  %p283_p9 = scmp.lt.s32.totalorder %s116_s26, 255 }
  0x48   : > { %s636_s14 = scalar_lea.vmem [#allocation7], %s281_s25  ;;  %s176_s30 = sld [smem:[#allocation3 + %s175_s11]] }
  0x49   : > { %s726_s26 = smov (!%p117_p8, %s116_s26), 0  ;;  %p127_p12 = scmp.gt.s32.totalorder %s126_s4, 0 }
  0x4a   : > { %p288_p13 = scmp.lt.s32.totalorder %s126_s4, 255  ;;  %s728_s26 = smov (!%p283_p9, %s726_s26), 255 }
  0x4b   : > { %s730_s4 = smov (!%p127_p12, %s126_s4), 0  ;;  %p137_p1 = scmp.gt.s32.totalorder %s136_s5, 0 }
  0x4c   : > { %s121_s12 = scalar_lea.vmem [#allocation4], %s728_s26  ;;  %s732_s4 = smov (!%p288_p13, %s730_s4), 255 }
  0x4d   : > { %v122_v0 = vld [vmem:[%s121_s12] sm:$0x1]  ;;  %s138_s13 = scalar_select %p137_p1, %s136_s5, 0 }
  0x4e   : > { %v123_v1 = vmul.f32 11.313708, %v122_v0  ;;  %p293_p5 = scmp.lt.s32.totalorder %s136_s5, 255  ;;  %s131_s15 = scalar_lea.vmem [#allocation4], %s732_s4 }
  0x4f   : > { %v132_v2 = vld [vmem:[%s131_s15] sm:$0x1]  ;;  %p147_p6 = scmp.gt.s32.totalorder %s630_s8, 0  ;;  %p298_p7 = scmp.lt.s32.totalorder %s630_s8, 255 }
  0x50   : > { %124 = vst [vmem:[%s636_s14] sm:$0x1] %v123_v1  ;;  %v133_v3 = vmul.f32 11.313708, %v132_v2  ;;  %s734_s13 = smov (!%p293_p5, %s138_s13), 255  ;;  %p157_p10 = scmp.gt.s32.totalorder %s632_s9, 0 }
  0x51   : > { %s736_s8 = smov (!%p147_p6, %s630_s8), 0  ;;  %s141_s16 = scalar_lea.vmem [#allocation4], %s734_s13 }
  0x52   : > { %134 = vst [vmem:[%s636_s14 + $0x1] sm:$0x1] %v133_v3  ;;  %v142_v4 = vld [vmem:[%s141_s16] sm:$0x1]  ;;  %s738_s8 = smov (!%p298_p7, %s736_s8), 255  ;;  %p303_p11 = scmp.lt.s32.totalorder %s632_s9, 255 }
  0x53   : > { %v143_v5 = vmul.f32 11.313708, %v142_v4  ;;  %s158_s17 = scalar_select %p157_p10, %s632_s9, 0 }
  0x54   : > { %s151_s25 = scalar_lea.vmem [#allocation4], %s738_s8  ;;  %s166_s26 = sld [smem:[#allocation3 + %s165_s10]] }
  0x55   : > { %144 = vst [vmem:[%s636_s14 + $0x2] sm:$0x1] %v143_v5  ;;  %v152_v6 = vld [vmem:[%s151_s25] sm:$0x1]  ;;  %s740_s17 = smov (!%p303_p11, %s158_s17), 255  ;;  %s185_s3 = sadd.s32 7, %s621_s23 }
  0x56   : > { %v153_v7 = vmul.f32 11.313708, %v152_v6  ;;  %s161_s4 = scalar_lea.vmem [#allocation4], %s740_s17  ;;  %s186_s5 = sld [smem:[#allocation3 + %s185_s3]] }
  0x57   : > { %v162_v8 = vld [vmem:[%s161_s4] sm:$0x1]  ;;  %p177_p4 = scmp.gt.s32.totalorder %s176_s30, 0  ;;  %p313_p3 = scmp.lt.s32.totalorder %s176_s30, 255 }
  0x58   : > { %154 = vst [vmem:[%s636_s14 + $0x3] sm:$0x1] %v153_v7  ;;  %v163_v9 = vmul.f32 11.313708, %v162_v8  ;;  %s324_s7 = sshll.u32 %s557_s0, 7  ;;  %s209_s8 = sshll.u32 %s636_s14, 4  ;;  %s663_s8 = int_to_ptr.vmem [resolvable:$true] %s209_s8 }
  0x59   : > { %s744_s30 = smov (!%p177_p4, %s176_s30), 0  ;;  %s661_s12 = scalar_lea.hbm %s708_s2, %s324_s7 }
  0x5a   : > { %p167_p0 = scmp.gt.s32.totalorder %s166_s26, 0  ;;  %p308_p2 = scmp.lt.s32.totalorder %s166_s26, 255  ;;  %164 = vst [vmem:[%s636_s14 + $0x4] sm:$0x1] %v163_v9 }
  0x5b   : > { %s748_s30 = smov (!%p313_p3, %s744_s30), 255  ;;  %s196_s13 = scalar_lea.sflag [#allocation6], %s112_s18 }
  0x5c   : > { %s742_s26 = smov (!%p167_p0, %s166_s26), 0  ;;  %p187_p8 = scmp.gt.s32.totalorder %s186_s5, 0 }
  0x5d   : > { %s746_s26 = smov (!%p308_p2, %s742_s26), 255  ;;  %p318_p9 = scmp.lt.s32.totalorder %s186_s5, 255 }
  0x5e   : > { %s171_s23 = scalar_lea.vmem [#allocation4], %s746_s26  ;;  %s181_s6 = scalar_lea.vmem [#allocation4], %s748_s30 }
  0x5f   : > { %v172_v10 = vld [vmem:[%s171_s23] sm:$0x1]  ;;  %s750_s5 = smov (!%p187_p8, %s186_s5), 0  ;;  %s434_s15 = scalar_lea.vmem %s663_s8, 128 }
  0x60   : > { %v173_v11 = vmul.f32 11.313708, %v172_v10  ;;  %v182_v12 = vld [vmem:[%s181_s6] sm:$0x1]  ;;  %s752_s5 = smov (!%p318_p9, %s750_s5), 255  ;;  %p435_p12 = scmp.ne.s32.totalorder %s663_s8, %s434_s15 }
  0x61   : > { %v183_v13 = vmul.f32 11.313708, %v182_v12  ;;  %s191_s9 = scalar_lea.vmem [#allocation4], %s752_s5  ;;  %p719_p13 = scmp.ne.s32.totalorder %s712_s28, 0 }
  0x62   : > { %174 = vst [vmem:[%s636_s14 + $0x5] sm:$0x1] %v173_v11  ;;  %v192_v14 = vld [vmem:[%s191_s9] sm:$0x1]  ;;  %s508_s0 = smov [#allocation7]  }
  0x63   : > { %184 = vst [vmem:[%s636_s14 + $0x6] sm:$0x1] %v183_v13  ;;  %v193_v15 = vmul.f32 11.313708, %v192_v14  ;;  %p436_p1 = pnand %p435_p12, %p719_p13  ;;  %s438_s16 = sshll.u32 %s508_s0, 4  ;;  %s439_s16 = int_to_ptr.vmem [resolvable:$false] %s438_s16 }
  0x64   : > { %s440_s17 = scalar_lea.vmem %s439_s16, 256  ;;  %p441_p6 = scmp.lt.s32.totalorder %s663_s8, %s439_s16 }
  0x65   : > { %194 = vst [vmem:[%s636_s14 + $0x7] sm:$0x1] %v193_v15  ;;  %p437_p5 = pneg %p436_p1  ;;  %p442_p7 = scmp.lt.s32.totalorder %s440_s17, %s434_s15 }
  0x67   : > { %p443_p10 = por %p442_p7, %p441_p6 }
  0x69   : > { %p444_p11 = pnand %p443_p10, %p437_p5 }
  0x6b   : > { %447 = shalt.err (!%p444_p11)
}
  0x6c   : > { %s448_s18 = scalar_lea.hbm %s661_s12, 128  ;;  %s452_s26 = scalar_lea.hbm %s708_s2, 256 }
  0x6d   : > { %p449_p0 = scmp.ne.s32.totalorder %s661_s12, %s448_s18  ;;  %p453_p3 = scmp.lt.u32.totalorder %s661_s12, %s708_s2 }
  0x6e   : > { %p454_p8 = scmp.lt.u32.totalorder %s452_s26, %s448_s18  ;;  %p456_p12 = scmp.lt.u32.totalorder %s448_s18, %s661_s12 }
  0x6f   : > { %p450_p2 = pnand %p449_p0, %p719_p13 }
  0x70   : > { %p455_p9 = por %p454_p8, %p453_p3 }
  0x71   : > { %p451_p4 = pneg %p450_p2 }
  0x72   : > { %p457_p1 = por %p456_p12, %p455_p9 }
  0x74   : > { %p458_p5 = pnand %p457_p1, %p451_p4 }
  0x76   : > { %461 = shalt.err (!%p458_p5)
}
  0x77   : > { %347 = dma.vmem_to_hbm [thread:$0]  (%p719_p13), %s663_s8, 128, %s661_s12, %s196_s13  }
  0x78 PF: > { %p359_p6 = scmp.ge.s32.totalorder %s502_s22, 2  ;;  %s221_s4 = sand.u32 1, %s490_s19  }
  0x79   : > { %p720_p7 = scmp.ne.s32.totalorder %s713_s29, 0  ;;  %s222_s5 = scalar_lea.sflag [#allocation6], %s221_s4 }
  0x7b   : > { %p354_p10 = pnand %p359_p6, %p720_p7 }
  0x7d   : > { %485 = dma.done.wait (!%p354_p10), %s222_s5, 128  }
  0x7e   : > { %487 = vsyncadd (!%p354_p10), %s222_s5, 4294967168  ;;  %p17_p11 = scmp.ge.s32.totalorder %s561_s24, 4   ;;  %s721_s19 = smov %s494_s20 }
  0x7f   : > { %s722_s20 = smov %s498_s21  ;;  %s723_s21 = smov %s572_s27 }
  0x80   : > { %s724_s22 = smov %s561_s24  ;;  %19 = sbr.rel (!%p17_p11) target bundleno = 16 (0x10), region = 69 }
  0x87   :  { %227 = vsyncpa [#allocation5], 1 }
  0x88   :  { %229 = vsyncpa [#allocation5 + $0x1], 1 }
  0x89   :  { %230 = vsyncpa [#allocation6], 1 }
  0x8a   :  { %232 = vsyncpa [#allocation6 + $0x1], 1 }

</bundles_post_ra>
